<compile_context>
chip_gen: v6e
topology: v6e:2x2x1
jax: 0.10.0
libtpu: 0.0.40
codegen_flags: <defaults>
</compile_context>

<pallas_src>
import functools

import jax
import jax.numpy as jnp
from jax.experimental import pallas as pl
from jax.experimental.pallas import tpu as pltpu


# Large finite negative bias for masked keys.  -finfo(f32).max would overflow
# to -inf when added to negative scores and poison the online softmax with
# NaNs (exp(-inf - -inf)); -1e9 still underflows exp() to exactly 0.
_MASK_BIAS = -1e9
# Finite "minus infinity" init for the running max.
_M_INIT = -1e30


def _vmem_limit_bytes():
    """Physical VMEM minus headroom, capped at 64 MiB (safe on v5e/v6e/v7x)."""
    phys = 64 * 1024 * 1024
    try:
        info = pltpu.get_tpu_info()
        phys = int(getattr(info, "vmem_capacity_bytes", phys))
    except Exception:
        pass
    return int(min(max(phys - 16 * 1024 * 1024, 32 * 1024 * 1024),
                   64 * 1024 * 1024))


_VMEM_LIMIT = _vmem_limit_bytes()


def _pick_tile(dim, candidates=(512, 256, 128)):
    """Largest candidate tile that evenly divides `dim`; else the full dim."""
    for t in candidates:
        if t <= dim and dim % t == 0:
            return t
    return dim


# --------------------------- projection kernel ------------------------------

def _linear_kernel(x_ref, w_ref, o_ref):
    o_ref[...] = jnp.dot(
        x_ref[...], w_ref[...], preferred_element_type=jnp.float32
    ).astype(o_ref.dtype)


def linear_nobias(x2d, w):
    """x2d: (R, Din), w: (Din, Dout) -> (R, Dout).

    Din is small in LDM cross-attention, so the contraction is done in one shot
    per block (no K grid axis, no accumulator scratch); the weight strip uses a
    constant index_map so it stays resident in VMEM across row tiles.
    """
    R, Din = x2d.shape
    Dout = w.shape[1]
    tm = _pick_tile(R, (1024, 512, 256, 128))
    tn = _pick_tile(Dout, (1024, 512, 256, 128))
    return pl.pallas_call(
        _linear_kernel,
        out_shape=jax.ShapeDtypeStruct((R, Dout), x2d.dtype),
        grid=(R // tm, Dout // tn),
        in_specs=[
            pl.BlockSpec((tm, Din), lambda i, j: (i, 0)),
            pl.BlockSpec((Din, tn), lambda i, j: (0, j)),
        ],
        out_specs=pl.BlockSpec((tm, tn), lambda i, j: (i, j)),
        compiler_params=pltpu.CompilerParams(
            dimension_semantics=("parallel", "parallel"),
            vmem_limit_bytes=_VMEM_LIMIT,
        ),
    )(x2d, w)


# ------------- fused flash attention + output projection kernel -------------

def _fused_attn_kernel(q_ref, k_ref, v_ref, bias_ref, wo_ref, bo_ref,
                       o_ref, m_sc, l_sc, acc_sc, *, heads):
    kv = pl.program_id(2)
    C = acc_sc.shape[-1]

    @pl.when(kv == 0)
    def _():
        m_sc[...] = jnp.full_like(m_sc, _M_INIT)
        l_sc[...] = jnp.zeros_like(l_sc)
        acc_sc[...] = jnp.zeros_like(acc_sc)

    q = q_ref[0]          # (tq, H*C) bf16 -- scale already folded into wq
    k = k_ref[0]          # (tk, H*C) bf16
    v = v_ref[0]          # (tk, H*C) bf16
    bias = bias_ref[0]    # (1, tk)   f32 additive mask bias (0 keep / -1e9 drop)

    # Heads iterated inside the kernel; q/k/v blocks are lane-dense (H*C wide).
    # TODO(synk): on v6e/v7x a bf16 exp (EUP bf16) would roughly double
    # transcendental throughput; kept f32 here so v5e accuracy/behavior matches.
    for h in range(heads):
        q_h = q[:, h * C:(h + 1) * C]
        k_h = k[:, h * C:(h + 1) * C]
        v_h = v[:, h * C:(h + 1) * C]

        # q_h @ k_h^T without an explicit transpose; f32 accumulation.
        s = jax.lax.dot_general(
            q_h, k_h,
            dimension_numbers=(((1,), (1,)), ((), ())),
            preferred_element_type=jnp.float32,
        )                                                   # (tq, tk)
        s = s + bias

        m_prev = m_sc[h]                                    # (tq, 1)
        m_new = jnp.maximum(m_prev, jnp.max(s, axis=-1, keepdims=True))
        alpha = jnp.exp(m_prev - m_new)
        p = jnp.exp(s - m_new)
        l_sc[h] = alpha * l_sc[h] + jnp.sum(p, axis=-1, keepdims=True)
        acc_sc[h] = alpha * acc_sc[h] + jnp.dot(
            p.astype(v_h.dtype), v_h, preferred_element_type=jnp.float32
        )
        m_sc[h] = m_new

    @pl.when(kv == pl.num_programs(2) - 1)
    def _():
        # Normalize per head, re-assemble the (tq, H*C) activation in-vreg and
        # fuse the output projection -> lane-dense (tq, query_dim) store.
        parts = []
        for h in range(heads):
            inv_l = pl.reciprocal(l_sc[h], approx=True)
            parts.append(acc_sc[h] * inv_l)
        o_full = jnp.concatenate(parts, axis=-1)            # (tq, H*C) f32
        out = jnp.dot(
            o_full.astype(wo_ref.dtype), wo_ref[...],
            preferred_element_type=jnp.float32,
        )                                                   # (tq, Dq)
        o_ref[0] = (out + bo_ref[...]).astype(o_ref.dtype)


def fused_attention(q, k, v, bias, wo, bo, *, heads, out_dtype):
    """q: (B, N, H*C), k/v: (B, M, H*C), bias: (B, 1, M),
    wo: (H*C, Dq), bo: (1, Dq)  ->  (B, N, Dq)."""
    B, N, inner = q.shape
    M = k.shape[1]
    Dq = wo.shape[1]
    C = inner // heads

    # Large tiles amortize the ~0.35 us per-grid-step overhead; with bf16
    # inputs even (512, 1024) tiles at inner<=1280 stay a few MiB, well inside
    # v7x's 64 MiB per-core VMEM (and v5e/v6e's 128 MiB).
    tq = _pick_tile(N, (512, 256, 128))
    tk = _pick_tile(M, (1024, 512, 256, 128))

    kernel = functools.partial(_fused_attn_kernel, heads=heads)
    return pl.pallas_call(
        kernel,
        out_shape=jax.ShapeDtypeStruct((B, N, Dq), out_dtype),
        grid=(B, N // tq, M // tk),
        in_specs=[
            pl.BlockSpec((1, tq, inner), lambda b, i, j: (b, i, 0)),
            pl.BlockSpec((1, tk, inner), lambda b, i, j: (b, j, 0)),
            pl.BlockSpec((1, tk, inner), lambda b, i, j: (b, j, 0)),
            # Mask bias stays (B, 1, M) in HBM; shared across heads for free.
            pl.BlockSpec((1, 1, tk), lambda b, i, j: (b, 0, j)),
            # Output-projection weight/bias: constant index -> VMEM-resident.
            pl.BlockSpec((inner, Dq), lambda b, i, j: (0, 0)),
            pl.BlockSpec((1, Dq), lambda b, i, j: (0, 0)),
        ],
        out_specs=pl.BlockSpec((1, tq, Dq), lambda b, i, j: (b, i, 0)),
        scratch_shapes=[
            pltpu.VMEM((heads, tq, 1), jnp.float32),   # running max m (per head)
            pltpu.VMEM((heads, tq, 1), jnp.float32),   # running sum l (per head)
            pltpu.VMEM((heads, tq, C), jnp.float32),   # output accumulator
        ],
        compiler_params=pltpu.CompilerParams(
            dimension_semantics=("parallel", "parallel", "arbitrary"),
            vmem_limit_bytes=_VMEM_LIMIT,
        ),
    )(q, k, v, bias, wo, bo)


# ------------------------------- module glue --------------------------------

def init_cross_attention_params(key, query_dim, key_dim, value_dim, heads, dim_head):
    inner_dim = dim_head * heads
    k1, k2, k3, k4, k5 = jax.random.split(key, 5)
    s = 0.02
    return {
        # PyTorch nn.Linear weight layout: (out_features, in_features)
        "wq": s * jax.random.normal(k1, (inner_dim, query_dim), jnp.float32),
        "wk": s * jax.random.normal(k2, (inner_dim, key_dim), jnp.float32),
        "wv": s * jax.random.normal(k3, (inner_dim, value_dim), jnp.float32),
        "wo": s * jax.random.normal(k4, (query_dim, inner_dim), jnp.float32),
        "bo": s * jax.random.normal(k5, (query_dim,), jnp.float32),
    }


def cross_attention_forward(params, x, key, value, mask=None, heads=8,
                            compute_dtype=jnp.bfloat16):
    """CrossAttention.forward.  MXU operands in `compute_dtype` (bf16 by
    default, f32 accumulation); softmax math stays f32."""
    B, N, _ = x.shape
    _, M, _ = key.shape
    H = heads
    inner = params["wq"].shape[0]
    C = inner // H
    scale = C ** (-0.5)

    cd = compute_dtype
    # Fold the 1/sqrt(dim_head) scale into the q projection weights: free.
    wq_t = (params["wq"].T * scale).astype(cd)
    wk_t = params["wk"].T.astype(cd)
    wv_t = params["wv"].T.astype(cd)
    wo_t = params["wo"].T.astype(cd)                  # (inner, query_dim)
    bo = params["bo"][None, :].astype(jnp.float32)    # (1, query_dim)

    # Projections.  Outputs stay in (B, L, H*C) layout -- no head-split
    # transposes in HBM; heads are handled inside the attention kernel.
    q = linear_nobias(x.reshape(B * N, -1).astype(cd), wq_t).reshape(B, N, inner)
    k = linear_nobias(key.reshape(B * M, -1).astype(cd), wk_t).reshape(B, M, inner)
    v = linear_nobias(value.reshape(B * M, -1).astype(cd), wv_t).reshape(B, M, inner)

    # Additive mask bias at (B, 1, M); finite (-1e9) to keep online softmax
    # NaN-free even if a whole kv tile is masked for some rows.
    if mask is None:
        bias = jnp.zeros((B, 1, M), jnp.float32)
    else:
        bias = jnp.where(mask[:, None, :], 0.0, _MASK_BIAS).astype(jnp.float32)

    # Fused attention + output projection (+ bias).  Dropout(p=0) is identity.
    return fused_attention(q, k, v, bias, wo_t, bo, heads=H, out_dtype=x.dtype)


# Pure-JAX f32 reference (mirrors the PyTorch module) for sanity checking.
def cross_attention_reference(params, x, key, value, mask=None, heads=8):
    B, N, _ = x.shape
    _, M, _ = key.shape
    H = heads
    inner = params["wq"].shape[0]
    C = inner // H
    scale = C ** (-0.5)
    q = (x @ params["wq"].T).reshape(B, N, H, C).transpose(0, 2, 1, 3).reshape(B * H, N, C)
    k = (key @ params["wk"].T).reshape(B, M, H, C).transpose(0, 2, 1, 3).reshape(B * H, M, C)
    v = (value @ params["wv"].T).reshape(B, M, H, C).transpose(0, 2, 1, 3).reshape(B * H, M, C)
    sim = jnp.einsum("bid,bjd->bij", q, k) * scale
    if mask is not None:
        mbh = jnp.repeat(mask[:, None, :], H, axis=1).reshape(B * H, 1, M)
        sim = jnp.where(mbh, sim, -jnp.finfo(sim.dtype).max)
    attn = jax.nn.softmax(sim, axis=-1)
    out = jnp.einsum("bij,bjd->bid", attn, v)
    out = out.reshape(B, H, N, C).transpose(0, 2, 1, 3).reshape(B, N, H * C)
    return out @ params["wo"].T + params["bo"]


# ---------------------------------- main ------------------------------------

if __name__ == "__main__":
    B, N, M = 2, 8, 8
    query_dim, key_dim, value_dim = 32, 24, 16
    heads, dim_head = 2, 16

    root = jax.random.PRNGKey(0)
    kx, kk, kv, kp, km = jax.random.split(root, 5)

    x = jax.random.normal(kx, (B, N, query_dim), jnp.float32)
    key_in = jax.random.normal(kk, (B, M, key_dim), jnp.float32)
    value_in = jax.random.normal(kv, (B, M, value_dim), jnp.float32)
    mask = jax.random.bernoulli(km, 0.8, (B, M))
    mask = mask.at[:, 0].set(True)  # no fully-masked row (matches typical usage)

    params = init_cross_attention_params(
        kp, query_dim, key_dim, value_dim, heads, dim_head
    )

    out = cross_attention_forward(params, x, key_in, value_in, mask=mask, heads=heads)
    out = jax.block_until_ready(out)

    ref = cross_attention_reference(params, x, key_in, value_in, mask=mask, heads=heads)
    assert out.shape == (B, N, query_dim)
    # Tolerance absorbs bf16 MXU operands + approx-EUP reciprocal; outputs are
    # O(0.02-0.1) so the absolute kernel-vs-f32-reference error is ~1e-4.
    assert jnp.allclose(out, ref, atol=5e-3, rtol=5e-2), "mismatch vs reference"

    print("KERNEL_OK")
</pallas_src>

<mosaic_0001>
module attributes {stable_mosaic.version = 11 : i64} {
  func.func @_linear_kernel(%arg0: i32, %arg1: i32, %arg2: memref<16x32xbf16, #tpu.memory_space<vmem>>, %arg3: memref<32x32xbf16, #tpu.memory_space<vmem>>, %arg4: memref<16x32xbf16, #tpu.memory_space<vmem>>) attributes {dimension_semantics = [#tpu.dimension_semantics<parallel>, #tpu.dimension_semantics<parallel>], iteration_bounds = array<i64: 1, 1>, scalar_prefetch = 0 : i64, scratch_operands = 0 : i64, tpu.core_type = #tpu.core_type<tc>, window_params = [{transform_indices = @transform_0, window_bounds = array<i64: 16, 32>}, {transform_indices = @transform_1, window_bounds = array<i64: 32, 32>}, {transform_indices = @transform_2, window_bounds = array<i64: 16, 32>}]} {
    %c0 = arith.constant 0 : index
    %c0_0 = arith.constant 0 : index
    %0 = vector.load %arg2[%c0, %c0_0] : memref<16x32xbf16, #tpu.memory_space<vmem>>, vector<16x32xbf16>
    %c0_1 = arith.constant 0 : index
    %c0_2 = arith.constant 0 : index
    %1 = vector.load %arg3[%c0_1, %c0_2] : memref<32x32xbf16, #tpu.memory_space<vmem>>, vector<32x32xbf16>
    %cst = arith.constant dense<0.000000e+00> : vector<16x32xf32>
    %2 = tpu.matmul %0, %1, %cst {dimension_numbers = #tpu.dot_dimension_numbers<[1], [0], [0], [1], [0, 0, 1, 1], [], []>} : vector<16x32xbf16>, vector<32x32xbf16>, vector<16x32xf32> -> vector<16x32xf32>
    %3 = arith.truncf %2 : vector<16x32xf32> to vector<16x32xbf16>
    %c0_3 = arith.constant 0 : index
    %c0_4 = arith.constant 0 : index
    %4 = vector.load %arg4[%c0_3, %c0_4] : memref<16x32xbf16, #tpu.memory_space<vmem>>, vector<16x32xbf16>
    tpu.vector_store %arg4[%c0_3, %c0_4], %3 {strides = array<i32>} : memref<16x32xbf16, #tpu.memory_space<vmem>>, vector<16x32xbf16>,
    return
  }
  func.func @transform_0(%arg0: i32, %arg1: i32) -> (i32, i32) {
    %c0_i32 = arith.constant 0 : i32
    %c0_i32_0 = arith.constant 0 : i32
    return %arg0, %c0_i32 : i32, i32
  }
  func.func @transform_1(%arg0: i32, %arg1: i32) -> (i32, i32) {
    %c0_i32 = arith.constant 0 : i32
    %c0_i32_0 = arith.constant 0 : i32
    return %c0_i32, %arg1 : i32, i32
  }
  func.func @transform_2(%arg0: i32, %arg1: i32) -> (i32, i32) {
    %c0_i32 = arith.constant 0 : i32
    return %arg0, %arg1 : i32, i32
  }
}

</mosaic_0001>

<bundles_post_ra>
// kernel: tpu_custom_call.1
= control target key start
LH: loop header
LB: loop body
LE: loop exit
PB: predicated region body
PF: predicated region fallthrough
CT: control target
= control target key end

     0   :  { %7 = vsyncpa [#allocation3], 0  ;;  %s273_s0 = inlined_call_operand.hbm [shape: bf16[16,32], index: 0, kind: input, shape index: {}]   ;;  %s274_s1 = inlined_call_operand.hbm [shape: bf16[32,32], index: 1, kind: input, shape index: {}]   ;;  %s275_s2 = inlined_call_operand.hbm [shape: bf16[16,32], index: 2, kind: output, shape index: {}]  }
   0x1   :  { %8 = vsyncpa [#allocation6], 0 }
   0x2   :  { %9 = vsyncpa [#allocation4], 0  ;;  %s233_s9 = smov [#allocation2]  }
   0x3   :  { %s15_s10 = sshll.u32 %s233_s9, 4  ;;  %s16_s10 = int_to_ptr.vmem [resolvable:$true] %s15_s10 }
   0x4   :  { %s175_s11 = scalar_lea.vmem %s16_s10, 128  ;;  %p180_p1 = scmp.lt.s32.totalorder %s16_s10, %s16_s10 }
   0x5   :  { %p176_p0 = scmp.ne.s32.totalorder %s16_s10, %s175_s11  ;;  %p181_p2 = scmp.lt.s32.totalorder %s175_s11, %s175_s11 }
   0x7   :  { %p182_p3 = por %p181_p2, %p180_p1 }
   0x9   :  { %p183_p4 = pnand %p182_p3, %p176_p0 }
   0xb   :  { %186 = shalt.err (!%p183_p4)
}
   0xc   :  { %s234_s12 = smov 64   ;;  %s235_s13 = smov 4  }
   0xd   :  { %21 = dma.hbm_to_vmem [thread:$0]  %s273_s0, 128, %s16_s10, [#allocation3], %s234_s12, %s234_s12, %s235_s13  }
   0xe   :  { %s236_s16 = smov [#allocation5]  }
   0xf   :  { %s27_s17 = sshll.u32 %s236_s16, 4  ;;  %s28_s17 = int_to_ptr.vmem [resolvable:$true] %s27_s17 }
  0x10   :  { %s195_s18 = scalar_lea.vmem %s28_s17, 256  ;;  %p200_p6 = scmp.lt.s32.totalorder %s28_s17, %s28_s17 }
  0x11   :  { %p196_p5 = scmp.ne.s32.totalorder %s28_s17, %s195_s18  ;;  %p201_p7 = scmp.lt.s32.totalorder %s195_s18, %s195_s18 }
  0x13   :  { %p202_p8 = por %p201_p7, %p200_p6 }
  0x15   :  { %p203_p9 = pnand %p202_p8, %p196_p5 }
  0x17   :  { %206 = shalt.err (!%p203_p9)
}
  0x18   :  { %33 = dma.hbm_to_vmem [thread:$0]  %s274_s1, 256, %s28_s17, [#allocation6], %s234_s12, %s234_s12, %s235_s13  }
  0x19   :  { %227 = dma.done.wait [#allocation3], 128  }
  0x1a   :  { %228 = vsyncadd [#allocation3], 4294967168 }
  0x1b   :  { %229 = dma.done.wait [#allocation6], 256  }
  0x1c   :  { %230 = vsyncadd [#allocation6], 4294967040  ;;  %v237_v0 = vmov 0.0   ;;  %vm238_vm0 = vmmov 0   ;;  %v164_v1 = vld [vmem:[#allocation5 + $0x8] sm:$0xff]   ;;  %v165_v2 = vld [vmem:[#allocation5] sm:$0xff]  }
  0x1d   :  { %149 = vmatprep.subr.bf16.mxu0 %v237_v0  ;;  %153 = vmatprep.mubr.msk.bf16.mxu0 %vm238_vm0, %v237_v0  ;;  %v166_v3 = vld [vmem:[#allocation2] sm:$0xff]   ;;  %vm64_vm1 = vcmask 261120   ;;  %vm117_vm2 = vcmask 257024   ;;  %s239_s0 = smov [#allocation7]  }
  0x1e   :  { %150 = vmatpush3.bf16.msra.mxu0 %v164_v1  ;;  %s125_s1 = sshll.u32 %s239_s0, 4  ;;  %s126_s1 = int_to_ptr.vmem [resolvable:$true] %s125_s1 }
  0x1f   :  { %151 = vmatprep.subr.bf16.mxu0 %v237_v0  ;;  %s207_s21 = scalar_lea.vmem %s126_s1, 128  ;;  %p212_p11 = scmp.lt.s32.totalorder %s126_s1, %s126_s1 }
  0x20   :  { %p208_p10 = scmp.ne.s32.totalorder %s126_s1, %s207_s21  ;;  %p213_p12 = scmp.lt.s32.totalorder %s207_s21, %s207_s21 }
  0x22   :  { %152 = vmatpush3.bf16.msra.mxu0 %v165_v2  ;;  %p214_p13 = por %p213_p12, %p212_p11 }
  0x24   :  { %p215_p0 = pnand %p214_p13, %p208_p10 }
  0x25   :  { %154 = vmatmul.mubr.msk.bf16.vlgmr.msra.gmra.mxu0 %vm64_vm1, %v166_v3 }
  0xe5   :  { %v102_v4 = vpop.f32.mrf.mxu0 }
  0xe6   :  { %v144_v5 = vpack.c.bf16 %v102_v4, %v102_v4 }
  0xe7   :  { %v155_v6 = vpop.f32.mrf.mxu0 }
  0xe8   :  { %118 = vst.msk [vmem:[#allocation7] sm:$0xf] %vm117_vm2, %v144_v5 }
  0xe9   :  { %v105_v7 = vpop.f32.mrf.mxu0 }
  0xea   :  { %v145_v8 = vpack.c.bf16 %v105_v7, %v105_v7 }
  0xeb   :  { %v156_v9 = vpop.f32.mrf.mxu0 }
  0xec   :  { %119 = vst.msk [vmem:[#allocation7 + $0x4] sm:$0xf] %vm117_vm2, %v145_v8 }
  0xed   :  { %218 = shalt.err (!%p215_p0)
}
  0xee   :  { %131 = dma.vmem_to_hbm [thread:$0]  %s126_s1, 128, %s275_s2, [#allocation4], %s234_s12, %s234_s12, %s235_s13  }
  0xef   :  { %231 = dma.done.wait [#allocation4], 128  }
  0xf0   :  { %232 = vsyncadd [#allocation4], 4294967168 }
  0xf1   :  { %135 = vsyncpa [#allocation3], 1 }
  0xf2   :  { %136 = vsyncpa [#allocation6], 1 }
  0xf3   :  { %137 = vsyncpa [#allocation4], 1 }

</bundles_post_ra>
